<compile_context>
chip_gen: v6e
topology: v6e:2x2x1
jax: 0.10.0
libtpu: 0.0.40
codegen_flags: <defaults>
</compile_context>

<pallas_src>
import jax
import jax.numpy as jnp
from jax.experimental import pallas as pl
from jax.experimental.pallas import tpu as pltpu


def _round_up(x, m):
    return ((x + m - 1) // m) * m


def _vmem_capacity_bytes():
    try:
        return int(pltpu.get_tpu_info().vmem_capacity_bytes)
    except Exception:
        return 64 << 20  # conservative: v7x per-TensorCore VMEM


def _choose_time_block(S, B, in_cols, out_cols, itemsize):
    """Pick a time tile that (a) divides S, (b) keeps m_blk = tb*B a multiple
    of 8 (f32 sublane) for partial tiles, (c) fits a per-tile VMEM budget and
    (d) leaves n_steps >= 2 when possible (pipelining + v7x megacore)."""
    per_row = (in_cols + out_cols) * itemsize
    capacity = _vmem_capacity_bytes()
    # ~4 MiB per tile: big enough to hide the ~0.35us per-grid-step overhead,
    # small enough that double-buffered tiles stay well inside the scoped
    # VMEM defaults on every generation (16 MiB v5e, 32 MiB v6e/v7x).
    target_tile_bytes = min(4 << 20, max(1 << 20, capacity // 32))
    target_tb = max(1, target_tile_bytes // (per_row * B))

    divisors = [d for d in range(1, S + 1) if S % d == 0]
    partial = [d for d in divisors if d < S and (d * B) % 8 == 0]
    fitting = [d for d in partial if d <= target_tb]
    if fitting:
        return max(fitting)
    if partial:
        return min(partial)
    return S  # full-array block (exempt from the sublane-multiple rule)


def rnn_kernel(x_ref, wt_ref, h0_ref, ht_ref, out_ref):
    # x_ref  : (m_blk, I)      streamed time-tile of X (row index = t*B + b)
    # wt_ref : (I, Hd_pad)     resident, pre-transposed W (zero-padded cols)
    # h0_ref : (B, Hd)         resident initial hidden state
    # ht_ref : (Hd, Hd_pad)    resident, pre-transposed H (zero-padded cols)
    # out_ref: (m_blk, Hd_pad)
    m_blk = out_ref.shape[0]
    batch = h0_ref.shape[0]

    # Main GEMM on the MXU (f32 accumulate).
    wx = jnp.dot(x_ref[...], wt_ref[...], preferred_element_type=jnp.float32)

    # Loop-invariant hidden contribution from tiny resident blocks
    # (B*Hd*Hd_pad FLOPs — noise on the MXU; replaces a separate XLA matmul
    # and any HBM-resident (S*B, Hd) bias tensor).
    wh = jnp.dot(h0_ref[...], ht_ref[...], preferred_element_type=jnp.float32)

    # Broadcast wh (B, Hd_pad) to every tile row via a one-hot selection
    # matmul: sel[i, b] = (i % B == b).  Row ordering matches
    # X.reshape(S*B, I) because time is the outer axis of X.
    rows = jax.lax.broadcasted_iota(jnp.int32, (m_blk, batch), 0)
    cols = jax.lax.broadcasted_iota(jnp.int32, (m_blk, batch), 1)
    sel = (rows % batch == cols).astype(jnp.float32)
    wh_rows = jnp.dot(sel, wh, preferred_element_type=jnp.float32)

    out_ref[...] = jnp.tanh(wx + wh_rows).astype(out_ref.dtype)


def rnn_forward(X, W, H, hidden_state=None, time_block=None):
    """Pallas equivalent of RNN.forward.

    X: (S, B, I); W: (Hd, I); H: (Hd, Hd); hidden_state: (B, Hd) or None.
    Returns (output (S, B, Hd), out (B, Hd)).
    """
    S, B, I = X.shape
    Hd = W.shape[0]
    dt = X.dtype
    itemsize = X.dtype.itemsize
    if hidden_state is None:
        hidden_state = jnp.zeros((B, Hd), dtype=dt)
    hidden_state = hidden_state.astype(dt)

    # Lane-dense padding of the hidden (output / MXU-N) dimension.
    Hd_pad = _round_up(Hd, 128)
    w_t = jnp.zeros((I, Hd_pad), dt).at[:, :Hd].set(W.T)
    h_t = jnp.zeros((Hd, Hd_pad), dt).at[:, :Hd].set(H.T)

    X_flat = X.reshape(S * B, I)

    if time_block is None:
        time_block = _choose_time_block(S, B, I, Hd_pad, itemsize)
    assert S % time_block == 0, "time_block must divide the sequence length"
    if time_block < S:
        assert (time_block * B) % 8 == 0, (
            "partial time tiles need (time_block * B) % 8 == 0 (f32 sublane)")
    n_steps = S // time_block
    m_blk = time_block * B

    # VMEM: double-buffered X/out tiles + double-buffered resident weights.
    tile_bytes = m_blk * (I + Hd_pad) * itemsize
    resident_bytes = (w_t.size + h_t.size + hidden_state.size) * itemsize
    vmem_limit = int(min(32 << 20,
                         max(2 * (tile_bytes + resident_bytes) + (2 << 20),
                             8 << 20)))

    cost = pl.CostEstimate(
        flops=2 * S * B * I * Hd_pad            # main GEMM
        + n_steps * 2 * B * Hd * Hd_pad         # hidden contribution
        + n_steps * 2 * m_blk * B * Hd_pad,     # one-hot broadcast matmul
        transcendentals=S * B * Hd_pad,
        bytes_accessed=itemsize * (X_flat.size + w_t.size + h_t.size
                                   + hidden_state.size + S * B * Hd_pad),
    )

    out_flat = pl.pallas_call(
        rnn_kernel,
        out_shape=jax.ShapeDtypeStruct((S * B, Hd_pad), dt),
        grid=(n_steps,),
        in_specs=[
            pl.BlockSpec((m_blk, I), lambda t: (t, 0)),      # X time-tile (streamed)
            pl.BlockSpec((I, Hd_pad), lambda t: (0, 0)),     # W.T      (resident)
            pl.BlockSpec((B, Hd), lambda t: (0, 0)),         # h0       (resident)
            pl.BlockSpec((Hd, Hd_pad), lambda t: (0, 0)),    # H.T      (resident)
        ],
        out_specs=pl.BlockSpec((m_blk, Hd_pad), lambda t: (t, 0)),
        # Time tiles are independent (no recurrence in the reference module),
        # so the grid axis can be sharded across v7x's two TensorCores.
        compiler_params=pltpu.CompilerParams(
            dimension_semantics=("parallel",),
            vmem_limit_bytes=vmem_limit,
        ),
        cost_estimate=cost,
    )(X_flat, w_t, hidden_state, h_t)

    output = out_flat.reshape(S, B, Hd_pad)[:, :, :Hd]
    return output, output[-1]


def rnn_reference(X, W, H, hidden_state=None):
    S, B, I = X.shape
    Hd = W.shape[0]
    if hidden_state is None:
        hidden_state = jnp.zeros((B, Hd), dtype=X.dtype)
    wh = hidden_state @ H.T                       # constant across steps
    output = jnp.tanh(jnp.einsum("sbi,hi->sbh", X, W) + wh[None])
    return output, output[-1]


if __name__ == "__main__":
    key = jax.random.PRNGKey(0)
    k_x, k_w, k_h, k_s = jax.random.split(key, 4)

    seq, batch, input_size, hidden_size = 8, 2, 16, 32

    X = jax.random.normal(k_x, (seq, batch, input_size), dtype=jnp.float32)
    W = jax.random.uniform(
        k_w, (hidden_size, input_size), dtype=jnp.float32,
        minval=-1.0 / input_size ** 0.5, maxval=1.0 / input_size ** 0.5)
    H = jax.random.uniform(
        k_h, (hidden_size, hidden_size), dtype=jnp.float32,
        minval=-1.0 / hidden_size ** 0.5, maxval=1.0 / hidden_size ** 0.5)
    h0 = jax.random.normal(k_s, (batch, hidden_size), dtype=jnp.float32)

    # Default (zero) hidden state — same path as the PyTorch module default.
    output, out = rnn_forward(X, W, H)
    jax.block_until_ready((output, out))
    ref_output, ref_out = rnn_reference(X, W, H)
    assert output.shape == (seq, batch, hidden_size)
    assert out.shape == (batch, hidden_size)
    assert jnp.allclose(output, ref_output, atol=1e-5, rtol=1e-5)
    assert jnp.allclose(out, ref_out, atol=1e-5, rtol=1e-5)

    # Explicit non-zero hidden state exercises the in-kernel h0 @ H.T path.
    output2, out2 = rnn_forward(X, W, H, hidden_state=h0)
    jax.block_until_ready((output2, out2))
    ref_output2, ref_out2 = rnn_reference(X, W, H, hidden_state=h0)
    assert jnp.allclose(output2, ref_output2, atol=1e-5, rtol=1e-5)
    assert jnp.allclose(out2, ref_out2, atol=1e-5, rtol=1e-5)

    print("KERNEL_OK")
</pallas_src>

<mosaic_0001>
module attributes {stable_mosaic.version = 11 : i64} {
  func.func @rnn_kernel(%arg0: i32, %arg1: memref<8x16xf32, #tpu.memory_space<vmem>>, %arg2: memref<16x128xf32, #tpu.memory_space<vmem>>, %arg3: memref<2x32xf32, #tpu.memory_space<vmem>>, %arg4: memref<32x128xf32, #tpu.memory_space<vmem>>, %arg5: memref<8x128xf32, #tpu.memory_space<vmem>>) attributes {dimension_semantics = [#tpu.dimension_semantics<parallel>], iteration_bounds = array<i64: 2>, scalar_prefetch = 0 : i64, scratch_operands = 0 : i64, tpu.core_type = #tpu.core_type<tc>, window_params = [{transform_indices = @transform_0, window_bounds = array<i64: 8, 16>}, {pipeline_mode = #tpu.pipeline_mode<synchronous>, transform_indices = @transform_1, window_bounds = array<i64: 16, 128>}, {pipeline_mode = #tpu.pipeline_mode<synchronous>, transform_indices = @transform_2, window_bounds = array<i64: 2, 32>}, {pipeline_mode = #tpu.pipeline_mode<synchronous>, transform_indices = @transform_3, window_bounds = array<i64: 32, 128>}, {transform_indices = @transform_4, window_bounds = array<i64: 8, 128>}]} {
    %c0 = arith.constant 0 : index
    %c0_0 = arith.constant 0 : index
    %0 = vector.load %arg1[%c0, %c0_0] : memref<8x16xf32, #tpu.memory_space<vmem>>, vector<8x16xf32>
    %c0_1 = arith.constant 0 : index
    %c0_2 = arith.constant 0 : index
    %1 = vector.load %arg2[%c0_1, %c0_2] : memref<16x128xf32, #tpu.memory_space<vmem>>, vector<16x128xf32>
    %cst = arith.constant dense<0.000000e+00> : vector<8x128xf32>
    %2 = tpu.matmul %0, %1, %cst {dimension_numbers = #tpu.dot_dimension_numbers<[1], [0], [0], [1], [0, 0, 1, 1], [], []>} : vector<8x16xf32>, vector<16x128xf32>, vector<8x128xf32> -> vector<8x128xf32>
    %c0_3 = arith.constant 0 : index
    %c0_4 = arith.constant 0 : index
    %3 = vector.load %arg3[%c0_3, %c0_4] : memref<2x32xf32, #tpu.memory_space<vmem>>, vector<2x32xf32>
    %c0_5 = arith.constant 0 : index
    %c0_6 = arith.constant 0 : index
    %4 = vector.load %arg4[%c0_5, %c0_6] : memref<32x128xf32, #tpu.memory_space<vmem>>, vector<32x128xf32>
    %cst_7 = arith.constant dense<0.000000e+00> : vector<2x128xf32>
    %5 = tpu.matmul %3, %4, %cst_7 {dimension_numbers = #tpu.dot_dimension_numbers<[1], [0], [0], [1], [0, 0, 1, 1], [], []>} : vector<2x32xf32>, vector<32x128xf32>, vector<2x128xf32> -> vector<2x128xf32>
    %6 = tpu.iota {dimensions = array<i32: 0>} : vector<8x2xi32>
    %7 = tpu.iota {dimensions = array<i32: 1>} : vector<8x2xi32>
    %c2_i32 = arith.constant 2 : i32
    %c0_i32 = arith.constant 0 : i32
    %8 = arith.cmpi eq, %c2_i32, %c0_i32 : i32
    %c1_i32 = arith.constant 1 : i32
    %9 = arith.select %8, %c1_i32, %c2_i32 : i32
    %10 = vector.broadcast %9 : i32 to vector<8x2xi32>
    %11 = arith.remsi %6, %10 : vector<8x2xi32>
    %c0_i32_8 = arith.constant 0 : i32
    %12 = vector.broadcast %c0_i32_8 : i32 to vector<8x2xi32>
    %13 = arith.cmpi ne, %11, %12 : vector<8x2xi32>
    %c0_i32_9 = arith.constant 0 : i32
    %14 = vector.broadcast %c0_i32_9 : i32 to vector<8x2xi32>
    %15 = arith.cmpi slt, %11, %14 : vector<8x2xi32>
    %c0_i32_10 = arith.constant 0 : i32
    %16 = arith.cmpi slt, %9, %c0_i32_10 : i32
    %17 = vector.broadcast %16 : i1 to vector<8x2xi1>
    %18 = vector.broadcast %17 : vector<8x2xi1> to vector<8x2xi1>
    %19 = arith.xori %15, %18 : vector<8x2xi1>
    %20 = arith.andi %19, %13 : vector<8x2xi1>
    %21 = vector.broadcast %9 : i32 to vector<8x2xi32>
    %22 = arith.addi %11, %21 : vector<8x2xi32>
    %23 = arith.select %20, %22, %11 : vector<8x2xi1>, vector<8x2xi32>
    %24 = arith.cmpi eq, %23, %7 : vector<8x2xi32>
    %25 = arith.extui %24 : vector<8x2xi1> to vector<8x2xi32>
    %26 = arith.sitofp %25 : vector<8x2xi32> to vector<8x2xf32>
    %cst_11 = arith.constant dense<0.000000e+00> : vector<8x128xf32>
    %27 = tpu.matmul %26, %5, %cst_11 {dimension_numbers = #tpu.dot_dimension_numbers<[1], [0], [0], [1], [0, 0, 1, 1], [], []>} : vector<8x2xf32>, vector<2x128xf32>, vector<8x128xf32> -> vector<8x128xf32>
    %28 = arith.addf %2, %27 : vector<8x128xf32>
    %29 = math.tanh %28 : vector<8x128xf32>
    %c0_12 = arith.constant 0 : index
    %c0_13 = arith.constant 0 : index
    %30 = vector.load %arg5[%c0_12, %c0_13] : memref<8x128xf32, #tpu.memory_space<vmem>>, vector<8x128xf32>
    tpu.vector_store %arg5[%c0_12, %c0_13], %29 {strides = array<i32>} : memref<8x128xf32, #tpu.memory_space<vmem>>, vector<8x128xf32>,
    return
  }
  func.func @transform_0(%arg0: i32) -> (i32, i32) {
    %c0_i32 = arith.constant 0 : i32
    %c0_i32_0 = arith.constant 0 : i32
    return %arg0, %c0_i32 : i32, i32
  }
  func.func @transform_1(%arg0: i32) -> (i32, i32) {
    %c0_i32 = arith.constant 0 : i32
    %c0_i32_0 = arith.constant 0 : i32
    %c0_i32_1 = arith.constant 0 : i32
    return %c0_i32, %c0_i32_0 : i32, i32
  }
  func.func @transform_2(%arg0: i32) -> (i32, i32) {
    %c0_i32 = arith.constant 0 : i32
    %c0_i32_0 = arith.constant 0 : i32
    %c0_i32_1 = arith.constant 0 : i32
    return %c0_i32, %c0_i32_0 : i32, i32
  }
  func.func @transform_3(%arg0: i32) -> (i32, i32) {
    %c0_i32 = arith.constant 0 : i32
    %c0_i32_0 = arith.constant 0 : i32
    %c0_i32_1 = arith.constant 0 : i32
    return %c0_i32, %c0_i32_0 : i32, i32
  }
  func.func @transform_4(%arg0: i32) -> (i32, i32) {
    %c0_i32 = arith.constant 0 : i32
    %c0_i32_0 = arith.constant 0 : i32
    return %arg0, %c0_i32 : i32, i32
  }
}

</mosaic_0001>

<bundles_post_ra>
// kernel: tpu_custom_call.1
= control target key start
LH: loop header
LB: loop body
LE: loop exit
PB: predicated region body
PF: predicated region fallthrough
CT: control target
= control target key end

     0   :  { %9 = vsyncpa [#allocation3], 0  ;;  %s1094_s0 = inlined_call_operand.hbm [shape: f32[16,16], index: 0, kind: input, shape index: {}]   ;;  %s1095_s1 = inlined_call_operand.hbm [shape: f32[16,128], index: 1, kind: input, shape index: {}]   ;;  %s1096_s2 = inlined_call_operand.vmem [shape: f32[2,32], index: 2, kind: input, shape index: {}]   ;;  %s1097_s3 = inlined_call_operand.hbm [shape: f32[32,128], index: 3, kind: input, shape index: {}]   ;;  %s1098_s4 = inlined_call_operand.hbm [shape: f32[16,128], index: 4, kind: output, shape index: {}]  }
   0x1   :  { %11 = vsyncpa [#allocation3 + $0x1], 0 }
   0x2   :  { %12 = vsyncpa [#allocation6], 0 }
   0x3   :  { %13 = vsyncpa [#allocation4], 0 }
   0x4   :  { %15 = vsyncpa [#allocation4 + $0x1], 0  ;;  %s910_s15 = smov 0   ;;  %s912_s16 = smov 0  }
   0x5   :  { %s914_s17 = smov 0   ;;  %s916_s18 = smov 0  }
   0x6 LB: > { %s931_s19 = sadd.s32 4294967295, %s875_s18   ;;  %s600_s20 = sadd.s32 4294967294, %s875_s18   ;;  %s875_s18 = sphi %s916_s18, %s1120_s18   ;;  %s871_s17 = sphi %s914_s17, %s1119_s17   ;;  %s867_s16 = sphi %s912_s16, %s1118_s16   ;;  %s863_s15 = sphi %s910_s15, %s1117_s15  }
   0x7   : > { %p41_p0 = scmp.ne.s32.totalorder %s867_s16, %s863_s15  ;;  %p1099_p1 = scmp.eq.s32.totalorder %s931_s19, 0 }
   0x8   : > { %p134_p3 = scmp.eq.s32.totalorder %s600_s20, 1  ;;  %p601_p5 = scmp.ge.s32.totalorder %s875_s18, 1 }
   0x9   : > { %p940_p4 = por %p1099_p1, %p41_p0  ;;  %p141_p7 = scmp.lt.s32.totalorder %s875_s18, 3 }
   0xa   : > { %p945_p6 = por %p134_p3, %p41_p0  ;;  %s877_s24 = smov [#allocation5]  }
   0xb   : > { %s1103_s21 = scalar_select %p940_p4, 1, 0 }
   0xc   : > { %s1104_s22 = scalar_select %p945_p6, 1, 0 }
   0xd   : > { %p950_p8 = pnand %p601_p5, %p141_p7  ;;  %s153_s25 = sshll.u32 %s877_s24, 4  ;;  %s154_s25 = int_to_ptr.vmem [resolvable:$true] %s153_s25 }
   0xe   : > { %s878_s27 = smov [#allocation7]   ;;  %s738_s29 = scalar_lea.vmem %s154_s25, 256 }
   0xf   : > { %s1105_s23 = scalar_select %p950_p8, 1, 0 }
  0x10   : > { %p666_p9 = pneg %p950_p8  ;;  %s169_s28 = sshll.u32 %s878_s27, 4  ;;  %s170_s28 = int_to_ptr.vmem [resolvable:$true] %s169_s28 }
  0x11   : > { %p739_p13 = scmp.ne.s32.totalorder %s154_s25, %s738_s29  ;;  %p746_p5 = scmp.lt.s32.totalorder %s154_s25, %s154_s25 }
  0x12   : > { %p959_p11 = pnand %p666_p9, %p1099_p1  ;;  %p747_p7 = scmp.lt.s32.totalorder %s738_s29, %s738_s29 }
  0x14   : > { %p729_p12 = pneg %p959_p11  ;;  %p748_p10 = por %p747_p7, %p746_p5 }
  0x16   : > { %p741_p0 = pnand %p739_p13, %p729_p12 }
  0x18   : > { %p742_p3 = pneg %p741_p0 }
  0x1a   : > { %p749_p9 = pnand %p748_p10, %p742_p3 }
  0x1c   : > { %752 = shalt.err (!%p749_p9)
}
  0x1d   : > { %s879_s30 = smov 128   ;;  %s880_s5 = smov 8  }
  0x1e   : > { %669 = dma.hbm_to_vmem [thread:$0]  (!%p959_p11), %s1095_s1, 256, %s154_s25, [#allocation6], %s879_s30, %s879_s30, %s880_s5  }
  0x1f   : > { %s764_s8 = scalar_lea.vmem %s170_s28, 512  ;;  %p772_p2 = scmp.lt.s32.totalorder %s170_s28, %s170_s28 }
  0x20   : > { %p765_p1 = scmp.ne.s32.totalorder %s170_s28, %s764_s8  ;;  %p773_p6 = scmp.lt.s32.totalorder %s764_s8, %s764_s8 }
  0x22   : > { %p767_p13 = pnand %p765_p1, %p729_p12  ;;  %p774_p5 = por %p773_p6, %p772_p2 }
  0x24   : > { %p768_p0 = pneg %p767_p13 }
  0x26   : > { %p775_p10 = pnand %p774_p5, %p768_p0 }
  0x28   : > { %778 = shalt.err (!%p775_p10)
}
  0x29   : > { %672 = dma.hbm_to_vmem [thread:$0]  (!%p959_p11), %s1097_s3, 512, %s170_s28, [#allocation6], %s879_s30, %s879_s30, %s880_s5  }
  0x2a   : > { %s982_s11 = sadd.s32 1, %s875_s18   ;;  %s28_s12 = sadd.s32 1, %s871_s17 }
  0x2b   : > { %s25_s13 = ssub.s32 %s875_s18, %s982_s11  ;;  %p35_p1 = scmp.ne.s32.totalorder %s871_s17, %s867_s16 }
  0x2c   : > { %p26_p2 = scmp.eq.s32.totalorder %s25_s13, 0  ;;  %p36_p6 = scmp.eq.s32.totalorder %s875_s18, 0 }
  0x2d   : > { %p1107_p12 = scmp.eq.s32.totalorder %s931_s19, 1  ;;  %p683_p7 = scmp.lt.s32.totalorder %s875_s18, 2 }
  0x2e   : > { %s998_s20 = scalar_select %p26_p2, %s871_s17, %s28_s12  }
  0x2f   : > { %p992_p3 = por %p1107_p12, %p35_p1  ;;  %p37_p9 = por %p36_p6, %p35_p1 }
  0x30   : > { %s183_s24 = sand.u32 1, %s871_s17   ;;  %s606_s26 = sshll.u32 %s875_s18, 7 }
  0x31   : > { %s1108_s14 = scalar_select %p992_p3, 1, 0 }
  0x32   : > { %s605_s25 = sshll.u32 %s183_s24, 3  ;;  %s1005_s29 = scalar_lea.hbm %s1094_s0, %s606_s26 }
  0x33   : > { %s187_s30 = scalar_lea.vmem [#allocation2], %s605_s25  ;;  %p1007_p11 = pnand %p683_p7, %p37_p9 }
  0x34   : > { %s194_s5 = sshll.u32 %s187_s30, 4  ;;  %s184_s7 = scalar_lea.sflag [#allocation3], %s183_s24  ;;  %s195_s5 = int_to_ptr.vmem [resolvable:$true] %s194_s5 }
  0x35   : > { %s779_s8 = scalar_lea.hbm %s1005_s29, 128  ;;  %p781_p0 = pneg %p1007_p11 }
  0x36   : > { %p780_p13 = scmp.ne.s32.totalorder %s1005_s29, %s779_s8  ;;  %s784_s12 = scalar_lea.hbm %s1094_s0, 256 }
  0x37   : > { %p785_p1 = scmp.lt.s32.totalorder %s1005_s29, %s1094_s0  ;;  %p786_p2 = scmp.lt.s32.totalorder %s784_s12, %s779_s8 }
  0x38   : > { %p782_p5 = pnand %p781_p0, %p780_p13 }
  0x39   : > { %p787_p6 = por %p786_p2, %p785_p1 }
  0x3a   : > { %p783_p10 = pneg %p782_p5 }
  0x3c   : > { %p788_p12 = pnand %p787_p6, %p783_p10 }
  0x3e   : > { %791 = shalt.err (!%p788_p12)
}
  0x3f   : > { %s792_s26 = scalar_lea.vmem %s195_s5, 128  ;;  %s881_s24 = smov [#allocation2]  }
  0x40   : > { %p793_p7 = scmp.ne.s32.totalorder %s195_s5, %s792_s26  ;;  %s797_s27 = sshll.u32 %s881_s24, 4  ;;  %s798_s27 = int_to_ptr.vmem [resolvable:$false] %s797_s27 }
  0x41   : > { %s799_s28 = scalar_lea.vmem %s798_s27, 256  ;;  %p800_p13 = scmp.lt.s32.totalorder %s195_s5, %s798_s27 }
  0x42   : > { %p795_p9 = pnand %p793_p7, %p781_p0  ;;  %p801_p5 = scmp.lt.s32.totalorder %s799_s28, %s792_s26 }
  0x44   : > { %p796_p3 = pneg %p795_p9  ;;  %p802_p4 = por %p801_p5, %p800_p13 }
  0x46   : > { %p803_p8 = pnand %p802_p4, %p796_p3 }
  0x48   : > { %806 = shalt.err (!%p803_p8)
}
  0x49   : > { %676 = dma.hbm_to_vmem [thread:$0]  (!%p1007_p11), %s1005_s29, 128, %s195_s5, %s184_s7  }
  0x4a   : > { %p1110_p10 = scmp.ne.s32.totalorder %s1105_s23, 0 }
  0x4b   : > { %s1028_s30 = sand.u32 (!%p1110_p10), 1, %s867_s16   ;;  %p1111_p4 = scmp.ne.s32.totalorder (!%p1110_p10), %s1103_s21, 0 }
  0x4c   : > { %203 = sbr.rel (%p1110_p10) target bundleno = 515 (0x203), region = 36  ;;  %s608_s8 = sshll.u32 (!%p1110_p10), %s1028_s30, 3 }
  0x4d   : > { %s206_s9 = scalar_lea.sflag (!%p1110_p10), [#allocation3], %s1028_s30  ;;  %s1034_s10 = scalar_lea.vmem (!%p1110_p10), [#allocation2], %s608_s8 }
  0x51   : > { %850 = dma.done.wait (%p1111_p4), %s206_s9, 128  }
  0x52   : > { %852 = vsyncadd (%p1111_p4), %s206_s9, 4294967168  ;;  %p1112_p8 = scmp.eq.s32.totalorder %s931_s19, 0 }
  0x54   : > { %854 = dma.done.wait (%p1112_p8), [#allocation6], 768   ;;  %p1113_p3 = pmov %p1112_p8 }
  0x55   : > { %v882_v0 = vmov 0.0   ;;  %vm883_vm0 = vmmov 0   ;;  %v249_v1 = vld [vmem:[#allocation7 + $0x18] sm:$0xff]  ;;  %v248_v2 = vld [vmem:[#allocation7 + $0x10] sm:$0xff]  ;;  %v247_v3 = vld [vmem:[#allocation7 + $0x8] sm:$0xff]  ;;  %vm250_vm1 = vcmask 261120   ;;  %v324_v6 = vlaneseq }
  0x56   : > { %856 = vsyncadd (%p1113_p3), [#allocation6], 4294966528  ;;  %631 = vmatprep.subr.mxu0 %v882_v0  ;;  %639 = vmatprep.mubr.msk.f32.mxu0 %vm883_vm0, %v882_v0  ;;  %v246_v4 = vld [vmem:[#allocation7] sm:$0xff]  ;;  %vm347_vm3 = vcmask 1041408   ;;  %vm343_vm4 = vcmask 15360   ;;  %v244_v12 = vld [vmem:[#allocation5 + $0x8] sm:$0xff] }
  0x57   : > { %642 = vmatprep.subr.mxu1 %v882_v0  ;;  %644 = vmatprep.mubr.msk.f32.mxu1 %vm883_vm0, %v882_v0  ;;  %v245_v5 = vld [vmem:[%s1096_s2] sm:$0x3]  ;;  %v325_v7 = vshrl.u32 %v324_v6, 7  ;;  %v327_v8 = vand.u32 127, %v324_v6  ;;  %v243_v14 = vld [vmem:[#allocation5] sm:$0xff]  ;;  %vm421_vm5 = vcmask 130048  }
  0x58   : > { %632 = vmatpush3.msra.mxu0 %v249_v1  ;;  %v242_v15 = vld [vmem:[%s1034_s10] sm:$0xff]  ;;  %s618_s29 = sshll.u32 %s931_s19, 7  ;;  %s241_s5 = scalar_lea.vmem [#allocation8], %s608_s8 }
  0x59   : > { %633 = vmatprep.subr.mxu0 %v882_v0  ;;  %v332_v9 = vand.u32 1, %v325_v7  ;;  %s511_s6 = sshll.u32 %s241_s5, 4  ;;  %s1057_s13 = scalar_lea.hbm %s1098_s4, %s618_s29  ;;  %s512_s6 = int_to_ptr.vmem [resolvable:$true] %s511_s6 }
  0x5a   : > { %634 = vmatpush3.msra.mxu0 %v248_v2  ;;  %s498_s25 = scalar_lea.sflag [#allocation4], %s1028_s30  ;;  %s807_s26 = scalar_lea.vmem %s512_s6, 128 }
  0x5b   : > { %635 = vmatprep.subr.mxu0 %v882_v0  ;;  %vm340_vm2 = vcmp.eq.s32.totalorder %v332_v9, %v327_v8  ;;  %p808_p11 = scmp.ne.s32.totalorder %s512_s6, %s807_s26  ;;  %p1114_p0 = scmp.ne.s32.totalorder %s1108_s14, 0 }
  0x5c   : > { %636 = vmatpush3.msra.mxu0 %v247_v3  ;;  %v613_v10 = vsel %vm340_vm2, 1.0, %v882_v0  ;;  %s884_s24 = smov [#allocation8]  }
  0x5d   : > { %637 = vmatprep.subr.mxu0 %v882_v0  ;;  %p809_p1 = pnand %p808_p11, %p1114_p0  ;;  %s811_s27 = sshll.u32 %s884_s24, 4  ;;  %s812_s27 = int_to_ptr.vmem [resolvable:$false] %s811_s27 }
  0x5e   : > { %638 = vmatpush3.msra.mxu0 %v246_v4  ;;  %s813_s19 = scalar_lea.vmem %s812_s27, 256  ;;  %p814_p6 = scmp.lt.s32.totalorder %s512_s6, %s812_s27 }
  0x5f   : > { %640 = vmatmul.mubr.msk.f32.vlgmr.msra.gmra.mxu0 %vm250_vm1, %v245_v5  ;;  %p810_p2 = pneg %p809_p1  ;;  %p815_p12 = scmp.lt.s32.totalorder %s813_s19, %s807_s26 }
  0x61   : > { %p816_p7 = por %p815_p12, %p814_p6 }
  0x63   : > { %p817_p9 = pnand %p816_p7, %p810_p2 }
 0x11f   : > { %v320_v11 = vpop.f32.mrf.mxu0 }
 0x120   : > { %643 = vmatpush3.msk.msra.mxu1 %vm347_vm3, %v320_v11 }
 0x121   : > { %v641_v13 = vpop.f32.mrf.mxu0  ;;  %645 = vmatmul.mubr.msk.f32.vlgmr.msra.gmra.mxu1 %vm343_vm4, %v613_v10  ;;  %647 = vmatprep.subr.mxu1 %v882_v0 }
 0x122   : > { %648 = vmatpush3.msra.mxu1 %v244_v12  ;;  %651 = vmatprep.mubr.msk.f32.mxu1 %vm883_vm0, %v882_v0 }
 0x123   : > { %649 = vmatprep.subr.mxu1 %v882_v0 }
 0x124   : > { %650 = vmatpush3.msra.mxu1 %v243_v14 }
 0x125   : > { %652 = vmatmul.mubr.msk.f32.vlgmr.msra.gmra.mxu1 %vm421_vm5, %v242_v15 }
 0x1e1   : > { %v417_v16 = vpop.f32.mrf.mxu1 }
 0x1e3   : > { %v646_v17 = vpop.f32.mrf.mxu1 }
 0x1e5   : > { %v491_v18 = vpop.f32.mrf.mxu1 }
 0x1e6   : > { %v492_v19 = vadd.f32 %v491_v18, %v417_v16 }
 0x1e7   : > { %v653_v20 = vpop.f32.mrf.mxu1 }
 0x1e8   : > { %725 = vtanh.f32 %v492_v19 }
 0x1f5   : > { %v726_v21 = vpop.eup %725 }
 0x1f6   : > { %496 = vst [vmem:[%s241_s5] sm:$0xff] %v726_v21 }
 0x1f7   : > { %820 = shalt.err (!%p817_p9)
}
 0x1f8   : > { %s821_s28 = scalar_lea.hbm %s1057_s13, 128  ;;  %s825_s9 = scalar_lea.hbm %s1098_s4, 256 }
 0x1f9   : > { %p822_p13 = scmp.ne.s32.totalorder %s1057_s13, %s821_s28  ;;  %p826_p4 = scmp.lt.s32.totalorder %s1057_s13, %s1098_s4 }
 0x1fa   : > { %p827_p8 = scmp.lt.s32.totalorder %s825_s9, %s821_s28 }
 0x1fb   : > { %p823_p5 = pnand %p822_p13, %p1114_p0 }
 0x1fc   : > { %p828_p3 = por %p827_p8, %p826_p4 }
 0x1fd   : > { %p824_p10 = pneg %p823_p5 }
 0x1ff   : > { %p829_p11 = pnand %p828_p3, %p824_p10 }
 0x201   : > { %832 = shalt.err (!%p829_p11)
}
 0x202   : > { %664 = dma.vmem_to_hbm [thread:$0]  (%p1114_p0), %s512_s6, 128, %s1057_s13, %s498_s25  }
 0x203 PF: > { %s523_s23 = sand.u32 1, %s863_s15   ;;  %p1115_p1 = scmp.ne.s32.totalorder %s1104_s22, 0 }
 0x204   : > { %p1116_p2 = scmp.ge.s32.totalorder %s875_s18, 2  ;;  %s524_s29 = scalar_lea.sflag [#allocation4], %s523_s23 }
 0x206   : > { %p678_p6 = pnand %p1116_p2, %p1115_p1 }
 0x208   : > { %p679_p12 = pneg %p678_p6 }
 0x20a   : > { %858 = dma.done.wait (%p679_p12), %s524_s29, 128  }
 0x20b   : > { %860 = vsyncadd (%p679_p12), %s524_s29, 4294967168  ;;  %p18_p7 = scmp.ge.s32.totalorder %s982_s11, 4   ;;  %s1117_s15 = smov %s867_s16 }
 0x20c   : > { %s1118_s16 = smov %s871_s17  ;;  %s1119_s17 = smov %s998_s20 }
 0x20d   : > { %s1120_s18 = smov %s982_s11  ;;  %20 = sbr.rel (!%p18_p7) target bundleno = 6 (0x6), region = 89 }
 0x212   :  { %529 = vsyncpa [#allocation3], 1 }
 0x213   :  { %531 = vsyncpa [#allocation3 + $0x1], 1 }
 0x214   :  { %532 = vsyncpa [#allocation6], 1 }
 0x215   :  { %533 = vsyncpa [#allocation4], 1 }
 0x216   :  { %535 = vsyncpa [#allocation4 + $0x1], 1 }

</bundles_post_ra>
